<compile_context>
chip_gen: v7x
topology: tpu7x:2x2x1
jax: 0.10.0
libtpu: 0.0.40
codegen_flags: <defaults>
</compile_context>

<pallas_src>
import functools

import jax
import jax.numpy as jnp
from jax.experimental import pallas as pl
from jax.experimental.pallas import tpu as pltpu


def _round_up(x, m):
    return (x + m - 1) // m * m


def _nll_kernel(logits_ref, targets_ref, mask_ref, out_ref,
                m_scr, l_scr, t_scr, s_scr,
                *, label_smoothing, num_classes, v_tile):
    # logits_ref: (row_tile, v_tile); targets/mask/out: (row_tile, 1)
    # scratch: running max / sum-exp / target-logit / raw-logit-sum, (row_tile, 1) f32
    k = pl.program_id(1)
    last_k = pl.num_programs(1) - 1
    smoothing = label_smoothing > 0.0
    # Only the last vocab tile can contain lanes >= num_classes (boundary block
    # padded with unspecified data by Pallas) -> mask only there, statically gated.
    needs_tail_mask = (num_classes % v_tile) != 0

    @pl.when(k == 0)
    def _init():
        m_scr[...] = jnp.full_like(m_scr, -jnp.inf)
        l_scr[...] = jnp.zeros_like(l_scr)
        t_scr[...] = jnp.zeros_like(t_scr)
        s_scr[...] = jnp.zeros_like(s_scr)

    x = logits_ref[...].astype(jnp.float32)                       # (R, v_tile)
    # k-invariant local lane iota; compare against shifted (R,1)/scalar values
    # instead of materializing absolute column indices.
    lane = jax.lax.broadcasted_iota(jnp.int32, x.shape, 1)
    hit = lane == (targets_ref[...] - k * v_tile)                 # (R, v_tile)

    def _accumulate(x_lse, x_raw):
        # x_lse: logits with invalid lanes at -inf; x_raw: invalid lanes at 0.
        m_prev = m_scr[...]
        m_new = jnp.maximum(m_prev, jnp.max(x_lse, axis=-1, keepdims=True))
        alpha = jnp.exp(m_prev - m_new)
        p_sum = jnp.sum(jnp.exp(x_lse - m_new), axis=-1, keepdims=True)
        l_scr[...] = alpha * l_scr[...] + p_sum
        # A hit lane is always < num_classes (targets assumed in [0, V)), so the
        # target gather needs no extra validity mask even on the tail tile.
        t_scr[...] = t_scr[...] + jnp.sum(jnp.where(hit, x_lse, 0.0),
                                          axis=-1, keepdims=True)
        if smoothing:
            s_scr[...] = s_scr[...] + jnp.sum(x_raw, axis=-1, keepdims=True)
        m_scr[...] = m_new

    if not needs_tail_mask:
        _accumulate(x, x)
    else:
        @pl.when(k != last_k)
        def _interior():           # fully in-bounds tiles: no masking work
            _accumulate(x, x)

        @pl.when(k == last_k)
        def _tail():               # mask the padded vocab lanes of the last tile
            valid = lane < (num_classes - k * v_tile)
            x_lse = jnp.where(valid, x, -jnp.inf)
            x_raw = jnp.where(valid, x, 0.0) if smoothing else x
            _accumulate(x_lse, x_raw)

    @pl.when(k == last_k)
    def _finalize():
        lse = m_scr[...] + jnp.log(l_scr[...])
        if smoothing:
            ls = label_smoothing
            # uses sum(log_probs) = sum(logits) - V*lse
            nll = ((1.0 - ls) * (lse - t_scr[...])
                   + ls * lse
                   - (ls / float(num_classes)) * s_scr[...])
        else:
            nll = lse - t_scr[...]
        out_ref[...] = nll * mask_ref[...]


def _masked_token_nll(logits, targets, mask, label_smoothing,
                      row_tile_cap=256, v_tile_cap=None):
    """Per-token masked NLL, shape (B, T), computed with a Pallas kernel."""
    assert row_tile_cap % 8 == 0
    B, T, V = logits.shape
    N = B * T
    itemsize = jnp.dtype(logits.dtype).itemsize

    # >= 2 row blocks whenever possible so both v7x TensorCores get work.
    row_tile = min(row_tile_cap, max(8, _round_up(pl.cdiv(N, 2), 8)))
    if v_tile_cap is None:
        # ~4 MiB logits block at row_tile=256 regardless of dtype; keeps the f32
        # in-kernel intermediates comfortably inside the 48 MiB VMEM limit.
        v_tile_cap = 8192 if itemsize <= 2 else 4096
    assert v_tile_cap % 128 == 0
    v_tile = min(v_tile_cap, _round_up(V, 128))

    grid = (pl.cdiv(N, row_tile), pl.cdiv(V, v_tile))

    # No padding / copy of the logits: partial boundary blocks are handled by
    # Pallas (out-of-range row writes discarded; padded vocab lanes masked on the
    # last vocab tile inside the kernel).  Reshape of (B,T,V)->(N,V) is free.
    logits_flat = logits.reshape(N, V)            # keep model dtype over HBM
    targets_flat = targets.reshape(N, 1).astype(jnp.int32)
    mask_flat = mask.reshape(N, 1).astype(jnp.float32)

    kernel = functools.partial(
        _nll_kernel, label_smoothing=float(label_smoothing),
        num_classes=V, v_tile=v_tile)

    cost = pl.CostEstimate(
        flops=8 * N * V,
        transcendentals=N * V,
        bytes_accessed=N * V * itemsize + 3 * N * 4)

    nll = pl.pallas_call(
        kernel,
        out_shape=jax.ShapeDtypeStruct((N, 1), jnp.float32),
        grid_spec=pltpu.PrefetchScalarGridSpec(
            num_scalar_prefetch=0,
            grid=grid,
            in_specs=[
                pl.BlockSpec((row_tile, v_tile), lambda i, k: (i, k)),
                pl.BlockSpec((row_tile, 1), lambda i, k: (i, 0)),
                pl.BlockSpec((row_tile, 1), lambda i, k: (i, 0)),
            ],
            out_specs=pl.BlockSpec((row_tile, 1), lambda i, k: (i, 0)),
            scratch_shapes=[pltpu.VMEM((row_tile, 1), jnp.float32)] * 4,
        ),
        compiler_params=pltpu.CompilerParams(
            dimension_semantics=("parallel", "arbitrary"),
            vmem_limit_bytes=48 * 1024 * 1024),
        cost_estimate=cost,
    )(logits_flat, targets_flat, mask_flat)

    return nll[:, 0].reshape(B, T)


def sequence_cross_entropy_with_logits(logits, targets, mask,
                                       label_smoothing=-1.0, reduce=None,
                                       loss_discount=1.0, end_length=-1):
    """JAX/Pallas port of the PyTorch reference (forward pass only)."""
    B, T, _ = logits.shape
    mask = mask.astype(jnp.float32)

    loss = _masked_token_nll(logits, targets, mask, label_smoothing)   # (B, T)

    if reduce:
        if end_length != -1 and reduce == "batch":
            scale = jnp.where(jnp.arange(T) < (T - end_length),
                              jnp.float32(loss_discount), jnp.float32(1.0))
            loss = loss * scale[None, :]
        loss = loss.sum(axis=1) / (mask.sum(axis=1) + 1e-13)            # (B,)
        if reduce == "batch":
            loss = loss.mean()                                          # scalar
    return loss


class SequenceCrossEntropyLoss:
    """Stateless module (no parameters) — mirrors the nn.Module interface."""

    def __call__(self, logits, targets, mask, label_smoothing=-1, reduce=None,
                 loss_discount=1, end_length=-1):
        return sequence_cross_entropy_with_logits(
            logits, targets, mask, label_smoothing, reduce, loss_discount, end_length)


def _reference(logits, targets, mask, label_smoothing, reduce,
               loss_discount=1.0, end_length=-1):
    """Pure-JAX reference for correctness sanity checks."""
    B, T, V = logits.shape
    log_probs = jax.nn.log_softmax(logits.reshape(-1, V).astype(jnp.float32), axis=-1)
    tflat = targets.reshape(-1).astype(jnp.int32)
    if label_smoothing > 0.0:
        sv = label_smoothing / V
        one_hot = jax.nn.one_hot(tflat, V) * (1.0 - label_smoothing) + sv
        nll = -(log_probs * one_hot).sum(-1)
    else:
        nll = -jnp.take_along_axis(log_probs, tflat[:, None], axis=1)[:, 0]
    loss = nll.reshape(B, T) * mask
    if reduce:
        if end_length != -1 and reduce == "batch":
            scale = jnp.where(jnp.arange(T) < (T - end_length), loss_discount, 1.0)
            loss = loss * scale[None, :]
        loss = loss.sum(1) / (mask.sum(1) + 1e-13)
        if reduce == "batch":
            loss = loss.mean()
    return loss


if __name__ == "__main__":
    # Small but deliberately non-aligned shapes: V=160 exercises the unpadded
    # boundary blocks (vocab tail masking + partial row block).
    B, T, V = 2, 12, 160
    key = jax.random.PRNGKey(0)
    k_logits, k_targets, k_mask = jax.random.split(key, 3)

    logits = jax.random.normal(k_logits, (B, T, V), dtype=jnp.float32)
    targets = jax.random.randint(k_targets, (B, T), 0, V, dtype=jnp.int32)
    # mask: ones with the tail of row 1 zeroed (padded positions)
    mask = jnp.ones((B, T), dtype=jnp.float32).at[1, T - 4:].set(0.0)

    loss_fn = SequenceCrossEntropyLoss()

    # default call: no smoothing, no reduction -> per-token loss (B, T)
    out_none = loss_fn(logits, targets, mask)
    # label smoothing + batch reduction -> scalar
    out_batch = loss_fn(logits, targets, mask, label_smoothing=0.1, reduce="batch",
                        loss_discount=0.5, end_length=2)
    # sentence reduction -> (B,)
    out_sent = loss_fn(logits, targets, mask, reduce="sentence")
    # explicitly exercise multi-row-tile + multi-vocab-tile (online LSE + tail mask)
    out_tiled = _masked_token_nll(logits, targets, mask, 0.1,
                                  row_tile_cap=8, v_tile_cap=128) * mask
    # bf16 logits over HBM (in-kernel f32 cast path)
    logits_bf16 = logits.astype(jnp.bfloat16)
    out_bf16 = loss_fn(logits_bf16, targets, mask, label_smoothing=0.1,
                       reduce="batch", loss_discount=0.5, end_length=2)

    jax.block_until_ready((out_none, out_batch, out_sent, out_tiled, out_bf16))

    # sanity checks against pure-JAX reference
    ref_none = _reference(logits, targets, mask, -1.0, None)
    ref_batch = _reference(logits, targets, mask, 0.1, "batch", 0.5, 2)
    ref_sent = _reference(logits, targets, mask, -1.0, "sentence")
    ref_tok_sm = _reference(logits, targets, mask, 0.1, None)
    ref_bf16 = _reference(logits_bf16.astype(jnp.float32), targets, mask,
                          0.1, "batch", 0.5, 2)
    assert jnp.allclose(out_none, ref_none, atol=1e-4)
    assert jnp.allclose(out_batch, ref_batch, atol=1e-4)
    assert jnp.allclose(out_sent, ref_sent, atol=1e-4)
    assert jnp.allclose(out_tiled, ref_tok_sm, atol=1e-4)
    assert jnp.allclose(out_bf16, ref_bf16, atol=1e-3)

    print("KERNEL_OK")
</pallas_src>

<mosaic_0001>
module attributes {stable_mosaic.version = 11 : i64} {
  func.func @_nll_kernel(%arg0: i32, %arg1: i32, %arg2: memref<16x256xf32, #tpu.memory_space<vmem>>, %arg3: memref<16x1xi32, #tpu.memory_space<vmem>>, %arg4: memref<16x1xf32, #tpu.memory_space<vmem>>, %arg5: memref<16x1xf32, #tpu.memory_space<vmem>>, %arg6: memref<16x1xf32, #tpu.memory_space<vmem>>, %arg7: memref<16x1xf32, #tpu.memory_space<vmem>>, %arg8: memref<16x1xf32, #tpu.memory_space<vmem>>, %arg9: memref<16x1xf32, #tpu.memory_space<vmem>>) attributes {dimension_semantics = [#tpu.dimension_semantics<parallel>, #tpu.dimension_semantics<arbitrary>], iteration_bounds = array<i64: 2, 1>, scalar_prefetch = 0 : i64, scratch_operands = 4 : i64, tpu.core_type = #tpu.core_type<tc>, window_params = [{transform_indices = @transform_0, window_bounds = array<i64: 16, 256>}, {transform_indices = @transform_1, window_bounds = array<i64: 16, 1>}, {transform_indices = @transform_2, window_bounds = array<i64: 16, 1>}, {transform_indices = @transform_3, window_bounds = array<i64: 16, 1>}]} {
    %c0_i32 = arith.constant 0 : i32
    %0 = arith.cmpi eq, %arg1, %c0_i32 : i32
    %1 = arith.extui %0 : i1 to i32
    %c0_i32_0 = arith.constant 0 : i32
    %2 = arith.cmpi ne, %1, %c0_i32_0 : i32
    scf.if %2 {
      %cst = arith.constant 0xFF800000 : f32
      %20 = vector.broadcast %cst : f32 to vector<16x1xf32>
      %c0_10 = arith.constant 0 : index
      %c0_11 = arith.constant 0 : index
      %21 = vector.load %arg6[%c0_10, %c0_11] : memref<16x1xf32, #tpu.memory_space<vmem>>, vector<16x1xf32>
      tpu.vector_store %arg6[%c0_10, %c0_11], %20 {strides = array<i32>} : memref<16x1xf32, #tpu.memory_space<vmem>>, vector<16x1xf32>,
      %cst_12 = arith.constant 0.000000e+00 : f32
      %22 = vector.broadcast %cst_12 : f32 to vector<16x1xf32>
      %c0_13 = arith.constant 0 : index
      %c0_14 = arith.constant 0 : index
      %23 = vector.load %arg7[%c0_13, %c0_14] : memref<16x1xf32, #tpu.memory_space<vmem>>, vector<16x1xf32>
      tpu.vector_store %arg7[%c0_13, %c0_14], %22 {strides = array<i32>} : memref<16x1xf32, #tpu.memory_space<vmem>>, vector<16x1xf32>,
      %cst_15 = arith.constant 0.000000e+00 : f32
      %24 = vector.broadcast %cst_15 : f32 to vector<16x1xf32>
      %c0_16 = arith.constant 0 : index
      %c0_17 = arith.constant 0 : index
      %25 = vector.load %arg8[%c0_16, %c0_17] : memref<16x1xf32, #tpu.memory_space<vmem>>, vector<16x1xf32>
      tpu.vector_store %arg8[%c0_16, %c0_17], %24 {strides = array<i32>} : memref<16x1xf32, #tpu.memory_space<vmem>>, vector<16x1xf32>,
      %cst_18 = arith.constant 0.000000e+00 : f32
      %26 = vector.broadcast %cst_18 : f32 to vector<16x1xf32>
      %c0_19 = arith.constant 0 : index
      %c0_20 = arith.constant 0 : index
      %27 = vector.load %arg9[%c0_19, %c0_20] : memref<16x1xf32, #tpu.memory_space<vmem>>, vector<16x1xf32>
      tpu.vector_store %arg9[%c0_19, %c0_20], %26 {strides = array<i32>} : memref<16x1xf32, #tpu.memory_space<vmem>>, vector<16x1xf32>,
    } else {
    }
    %c0 = arith.constant 0 : index
    %c0_1 = arith.constant 0 : index
    %3 = vector.load %arg2[%c0, %c0_1] : memref<16x256xf32, #tpu.memory_space<vmem>>, vector<16x256xf32>
    %4 = tpu.iota {dimensions = array<i32: 1>} : vector<16x256xi32>
    %c0_2 = arith.constant 0 : index
    %c0_3 = arith.constant 0 : index
    %5 = vector.load %arg3[%c0_2, %c0_3] : memref<16x1xi32, #tpu.memory_space<vmem>>, vector<16x1xi32>
    %c256_i32 = arith.constant 256 : i32
    %6 = arith.muli %arg1, %c256_i32 : i32
    %7 = vector.broadcast %6 : i32 to vector<16x1xi32>
    %8 = arith.subi %5, %7 : vector<16x1xi32>
    %9 = vector.broadcast %8 : vector<16x1xi32> to vector<16x256xi32>
    %10 = arith.cmpi eq, %4, %9 : vector<16x256xi32>
    %c0_i32_4 = arith.constant 0 : i32
    %11 = arith.cmpi ne, %arg1, %c0_i32_4 : i32
    %12 = arith.extui %11 : i1 to i32
    %c0_i32_5 = arith.constant 0 : i32
    %13 = arith.cmpi ne, %12, %c0_i32_5 : i32
    scf.if %13 {
      %c0_10 = arith.constant 0 : index
      %c0_11 = arith.constant 0 : index
      %20 = vector.load %arg6[%c0_10, %c0_11] : memref<16x1xf32, #tpu.memory_space<vmem>>, vector<16x1xf32>
      %cst = arith.constant dense<0xFF800000> : vector<16xf32>
      %21 = vector.multi_reduction <maximumf>, %3, %cst [1] : vector<16x256xf32> to vector<16xf32>
      %22 = vector.shape_cast %21 : vector<16xf32> to vector<16x1xf32>
      %23 = arith.maximumf %20, %22 : vector<16x1xf32>
      %24 = arith.subf %20, %23 : vector<16x1xf32>
      %25 = math.exp %24 : vector<16x1xf32>
      %26 = vector.broadcast %23 : vector<16x1xf32> to vector<16x256xf32>
      %27 = arith.subf %3, %26 : vector<16x256xf32>
      %28 = math.exp %27 : vector<16x256xf32>
      %cst_12 = arith.constant dense<0.000000e+00> : vector<16xf32>
      %29 = vector.multi_reduction <add>, %28, %cst_12 [1] : vector<16x256xf32> to vector<16xf32>
      %30 = vector.shape_cast %29 : vector<16xf32> to vector<16x1xf32>
      %c0_13 = arith.constant 0 : index
      %c0_14 = arith.constant 0 : index
      %31 = vector.load %arg7[%c0_13, %c0_14] : memref<16x1xf32, #tpu.memory_space<vmem>>, vector<16x1xf32>
      %32 = arith.mulf %25, %31 : vector<16x1xf32>
      %33 = arith.addf %32, %30 : vector<16x1xf32>
      %c0_15 = arith.constant 0 : index
      %c0_16 = arith.constant 0 : index
      %34 = vector.load %arg7[%c0_15, %c0_16] : memref<16x1xf32, #tpu.memory_space<vmem>>, vector<16x1xf32>
      tpu.vector_store %arg7[%c0_15, %c0_16], %33 {strides = array<i32>} : memref<16x1xf32, #tpu.memory_space<vmem>>, vector<16x1xf32>,
      %c0_17 = arith.constant 0 : index
      %c0_18 = arith.constant 0 : index
      %35 = vector.load %arg8[%c0_17, %c0_18] : memref<16x1xf32, #tpu.memory_space<vmem>>, vector<16x1xf32>
      %cst_19 = arith.constant 0.000000e+00 : f32
      %36 = vector.broadcast %cst_19 : f32 to vector<16x256xf32>
      %37 = arith.select %10, %3, %36 : vector<16x256xi1>, vector<16x256xf32>
      %cst_20 = arith.constant dense<0.000000e+00> : vector<16xf32>
      %38 = vector.multi_reduction <add>, %37, %cst_20 [1] : vector<16x256xf32> to vector<16xf32>
      %39 = vector.shape_cast %38 : vector<16xf32> to vector<16x1xf32>
      %40 = arith.addf %35, %39 : vector<16x1xf32>
      %c0_21 = arith.constant 0 : index
      %c0_22 = arith.constant 0 : index
      %41 = vector.load %arg8[%c0_21, %c0_22] : memref<16x1xf32, #tpu.memory_space<vmem>>, vector<16x1xf32>
      tpu.vector_store %arg8[%c0_21, %c0_22], %40 {strides = array<i32>} : memref<16x1xf32, #tpu.memory_space<vmem>>, vector<16x1xf32>,
      %c0_23 = arith.constant 0 : index
      %c0_24 = arith.constant 0 : index
      %42 = vector.load %arg6[%c0_23, %c0_24] : memref<16x1xf32, #tpu.memory_space<vmem>>, vector<16x1xf32>
      tpu.vector_store %arg6[%c0_23, %c0_24], %23 {strides = array<i32>} : memref<16x1xf32, #tpu.memory_space<vmem>>, vector<16x1xf32>,
    } else {
    }
    %c0_i32_6 = arith.constant 0 : i32
    %14 = arith.cmpi eq, %arg1, %c0_i32_6 : i32
    %15 = arith.extui %14 : i1 to i32
    %c0_i32_7 = arith.constant 0 : i32
    %16 = arith.cmpi ne, %15, %c0_i32_7 : i32
    scf.if %16 {
      %c256_i32_10 = arith.constant 256 : i32
      %20 = arith.muli %arg1, %c256_i32_10 : i32
      %c160_i32 = arith.constant 160 : i32
      %21 = arith.subi %c160_i32, %20 : i32
      %22 = vector.broadcast %21 : i32 to vector<16x256xi32>
      %23 = arith.cmpi slt, %4, %22 : vector<16x256xi32>
      %cst = arith.constant 0xFF800000 : f32
      %24 = vector.broadcast %cst : f32 to vector<16x256xf32>
      %25 = arith.select %23, %3, %24 : vector<16x256xi1>, vector<16x256xf32>
      %c0_11 = arith.constant 0 : index
      %c0_12 = arith.constant 0 : index
      %26 = vector.load %arg6[%c0_11, %c0_12] : memref<16x1xf32, #tpu.memory_space<vmem>>, vector<16x1xf32>
      %cst_13 = arith.constant dense<0xFF800000> : vector<16xf32>
      %27 = vector.multi_reduction <maximumf>, %25, %cst_13 [1] : vector<16x256xf32> to vector<16xf32>
      %28 = vector.shape_cast %27 : vector<16xf32> to vector<16x1xf32>
      %29 = arith.maximumf %26, %28 : vector<16x1xf32>
      %30 = arith.subf %26, %29 : vector<16x1xf32>
      %31 = math.exp %30 : vector<16x1xf32>
      %32 = vector.broadcast %29 : vector<16x1xf32> to vector<16x256xf32>
      %33 = arith.subf %25, %32 : vector<16x256xf32>
      %34 = math.exp %33 : vector<16x256xf32>
      %cst_14 = arith.constant dense<0.000000e+00> : vector<16xf32>
      %35 = vector.multi_reduction <add>, %34, %cst_14 [1] : vector<16x256xf32> to vector<16xf32>
      %36 = vector.shape_cast %35 : vector<16xf32> to vector<16x1xf32>
      %c0_15 = arith.constant 0 : index
      %c0_16 = arith.constant 0 : index
      %37 = vector.load %arg7[%c0_15, %c0_16] : memref<16x1xf32, #tpu.memory_space<vmem>>, vector<16x1xf32>
      %38 = arith.mulf %31, %37 : vector<16x1xf32>
      %39 = arith.addf %38, %36 : vector<16x1xf32>
      %c0_17 = arith.constant 0 : index
      %c0_18 = arith.constant 0 : index
      %40 = vector.load %arg7[%c0_17, %c0_18] : memref<16x1xf32, #tpu.memory_space<vmem>>, vector<16x1xf32>
      tpu.vector_store %arg7[%c0_17, %c0_18], %39 {strides = array<i32>} : memref<16x1xf32, #tpu.memory_space<vmem>>, vector<16x1xf32>,
      %c0_19 = arith.constant 0 : index
      %c0_20 = arith.constant 0 : index
      %41 = vector.load %arg8[%c0_19, %c0_20] : memref<16x1xf32, #tpu.memory_space<vmem>>, vector<16x1xf32>
      %cst_21 = arith.constant 0.000000e+00 : f32
      %42 = vector.broadcast %cst_21 : f32 to vector<16x256xf32>
      %43 = arith.select %10, %25, %42 : vector<16x256xi1>, vector<16x256xf32>
      %cst_22 = arith.constant dense<0.000000e+00> : vector<16xf32>
      %44 = vector.multi_reduction <add>, %43, %cst_22 [1] : vector<16x256xf32> to vector<16xf32>
      %45 = vector.shape_cast %44 : vector<16xf32> to vector<16x1xf32>
      %46 = arith.addf %41, %45 : vector<16x1xf32>
      %c0_23 = arith.constant 0 : index
      %c0_24 = arith.constant 0 : index
      %47 = vector.load %arg8[%c0_23, %c0_24] : memref<16x1xf32, #tpu.memory_space<vmem>>, vector<16x1xf32>
      tpu.vector_store %arg8[%c0_23, %c0_24], %46 {strides = array<i32>} : memref<16x1xf32, #tpu.memory_space<vmem>>, vector<16x1xf32>,
      %c0_25 = arith.constant 0 : index
      %c0_26 = arith.constant 0 : index
      %48 = vector.load %arg6[%c0_25, %c0_26] : memref<16x1xf32, #tpu.memory_space<vmem>>, vector<16x1xf32>
      tpu.vector_store %arg6[%c0_25, %c0_26], %29 {strides = array<i32>} : memref<16x1xf32, #tpu.memory_space<vmem>>, vector<16x1xf32>,
    } else {
    }
    %c0_i32_8 = arith.constant 0 : i32
    %17 = arith.cmpi eq, %arg1, %c0_i32_8 : i32
    %18 = arith.extui %17 : i1 to i32
    %c0_i32_9 = arith.constant 0 : i32
    %19 = arith.cmpi ne, %18, %c0_i32_9 : i32
    scf.if %19 {
      %c0_10 = arith.constant 0 : index
      %c0_11 = arith.constant 0 : index
      %20 = vector.load %arg6[%c0_10, %c0_11] : memref<16x1xf32, #tpu.memory_space<vmem>>, vector<16x1xf32>
      %c0_12 = arith.constant 0 : index
      %c0_13 = arith.constant 0 : index
      %21 = vector.load %arg7[%c0_12, %c0_13] : memref<16x1xf32, #tpu.memory_space<vmem>>, vector<16x1xf32>
      %22 = math.log %21 : vector<16x1xf32>
      %23 = arith.addf %20, %22 : vector<16x1xf32>
      %c0_14 = arith.constant 0 : index
      %c0_15 = arith.constant 0 : index
      %24 = vector.load %arg8[%c0_14, %c0_15] : memref<16x1xf32, #tpu.memory_space<vmem>>, vector<16x1xf32>
      %25 = arith.subf %23, %24 : vector<16x1xf32>
      %c0_16 = arith.constant 0 : index
      %c0_17 = arith.constant 0 : index
      %26 = vector.load %arg4[%c0_16, %c0_17] : memref<16x1xf32, #tpu.memory_space<vmem>>, vector<16x1xf32>
      %27 = arith.mulf %25, %26 : vector<16x1xf32>
      %c0_18 = arith.constant 0 : index
      %c0_19 = arith.constant 0 : index
      %28 = vector.load %arg5[%c0_18, %c0_19] : memref<16x1xf32, #tpu.memory_space<vmem>>, vector<16x1xf32>
      tpu.vector_store %arg5[%c0_18, %c0_19], %27 {strides = array<i32>} : memref<16x1xf32, #tpu.memory_space<vmem>>, vector<16x1xf32>,
    } else {
    }
    return
  }
  func.func @transform_0(%arg0: i32, %arg1: i32) -> (i32, i32) {
    %c0_i32 = arith.constant 0 : i32
    return %arg0, %arg1 : i32, i32
  }
  func.func @transform_1(%arg0: i32, %arg1: i32) -> (i32, i32) {
    %c0_i32 = arith.constant 0 : i32
    %c0_i32_0 = arith.constant 0 : i32
    return %arg0, %c0_i32 : i32, i32
  }
  func.func @transform_2(%arg0: i32, %arg1: i32) -> (i32, i32) {
    %c0_i32 = arith.constant 0 : i32
    %c0_i32_0 = arith.constant 0 : i32
    return %arg0, %c0_i32 : i32, i32
  }
  func.func @transform_3(%arg0: i32, %arg1: i32) -> (i32, i32) {
    %c0_i32 = arith.constant 0 : i32
    %c0_i32_0 = arith.constant 0 : i32
    return %arg0, %c0_i32 : i32, i32
  }
}

</mosaic_0001>

<bundles_post_ra>
// kernel: tpu_custom_call.1
= control target key start
LH: loop header
LB: loop body
LE: loop exit
PB: predicated region body
PF: predicated region fallthrough
CT: control target
= control target key end

     0   :  { %s1068_s12 = smov 0   ;;  %s1070_s13 = smov 0   ;;  %s1213_s0 = inlined_call_operand.vmem [shape: f32[24,160], index: 0, kind: input, shape index: {}]   ;;  %s1214_s1 = inlined_call_operand.vmem [shape: s32[24,1], index: 1, kind: input, shape index: {}]   ;;  %s1215_s2 = inlined_call_operand.vmem [shape: f32[24,1], index: 2, kind: input, shape index: {}]   ;;  %s1216_s3 = inlined_call_operand.vmem [shape: f32[24,1], index: 3, kind: output, shape index: {}]  }
   0x1   :  { %s1072_s14 = smov 0   ;;  %s1074_s15 = smov 0  }
   0x2   :  { %s1076_s16 = smov 0  }
   0x3 LB: > { %s782_s17 = sadd.s32 4294967295, %s1011_s16   ;;  %s25_s18 = sadd.s32 1, %s1007_s15  ;;  %s1011_s16 = sphi %s1076_s16, %s13_s16   ;;  %s1007_s15 = sphi %s1074_s15, %s1221_s15   ;;  %s1003_s14 = sphi %s1072_s14, %s1220_s14   ;;  %s999_s13 = sphi %s1070_s13, %s1219_s13   ;;  %s995_s12 = sphi %s1068_s12, %s1218_s12  }
   0x4   : > { %p27_p0 = scmp.ge.s32.totalorder %s25_s18, 2  ;;  %s112_s19 = sadd.s32 1, %s999_s13 }
   0x5   : > { %p122_p1 = scmp.ne.s32.totalorder %s999_s13, %s995_s12  ;;  %p123_p2 = scmp.eq.s32.totalorder %s782_s17, 1 }
   0x6   : > { %s1223_s18 = smov (%p27_p0, %s25_s18), 0  ;;  %p786_p4 = scmp.ge.s32.totalorder %s1011_s16, 1 }
   0x7   : > { %p1100_p3 = por %p123_p2, %p122_p1  ;;  %s109_s21 = ssub.s32 %s1007_s15, %s1223_s18 }
   0x8   : > { %p206_p5 = scmp.lt.s32.totalorder %s1011_s16, 3  ;;  %p110_p6 = scmp.eq.s32.totalorder %s109_s21, 0 }
   0xa   : > { %p207_p7 = pnand %p786_p4, %p206_p5 }
   0xb   : > { %s1109_s22 = scalar_select %p110_p6, %s999_s13, %s112_s19  }
   0xc   : > { %210 = sbr.rel (%p207_p7) target bundleno = 542 (0x21e), region = 32  ;;  %s1112_s23 = sshll.u32 (!%p207_p7), %s1003_s14, 1  ;;  %v329_v0 = vlaneseq (!%p207_p7)  ;;  %vm316_vm0 = vcmask (!%p207_p7), 7168   ;;  %v1045_v1 = vmov (!%p207_p7), -inf   ;;  %v1046_v12 = vmov (!%p207_p7), 0  }
   0xd   : > { %p264_p8 = scmp.lt.s32.totalorder (!%p207_p7), %s1112_s23, 2  ;;  %317 = vst.msk [vmem:[#allocation2] sm:$0xff] (!%p207_p7), %vm316_vm0, %v1045_v1  ;;  %318 = vst.msk [vmem:[#allocation2 + $0x8] sm:$0xff] (!%p207_p7), %vm316_vm0, %v1045_v1  ;;  %923 = vset.pattern.permute.xlu1 (!%p207_p7), %v1046_v12  ;;  %924 = vset.pattern.permute.xlu0 (!%p207_p7), %v1046_v12  ;;  %v1047_v13 = vmov (!%p207_p7), 0.0   ;;  %s254_s6 = sand.u32 (!%p207_p7), 1, %s995_s12  }
   0xe   : > { %v1117_v2 = vand.u32 (!%p207_p7), 127, %v329_v0  ;;  %319 = vst.msk [vmem:[#allocation3] sm:$0xff] (!%p207_p7), %vm316_vm0, %v1047_v13  ;;  %320 = vst.msk [vmem:[#allocation3 + $0x8] sm:$0xff] (!%p207_p7), %vm316_vm0, %v1047_v13  ;;  %s787_s10 = sshll.u32 (!%p207_p7), %s254_s6, 4 }
   0xf   : > { %321 = vst.msk [vmem:[#allocation4] sm:$0xff] (!%p207_p7), %vm316_vm0, %v1047_v13  ;;  %322 = vst.msk [vmem:[#allocation4 + $0x8] sm:$0xff] (!%p207_p7), %vm316_vm0, %v1047_v13  ;;  %s1161_s11 = scalar_lea.vmem (!%p207_p7), [#allocation6], %s787_s10  }
  0x10   : > { %v1123_v3 = vadd.s32 (!%p207_p7), 128, %v1117_v2 }
  0x12   : > { %vm429_vm1 = vcmp.lt.s32.totalorder (!%p207_p7), %v1123_v3, 160 }
  0x13   : > { %s1120_s24 = scalar_select %p264_p8, %s1112_s23, 2 }
  0x14   : > { %v434_v15 = vld [vmem:[#allocation2] sm:$0xff]  ;;  %v435_v18 = vld [vmem:[#allocation2 + $0x8] sm:$0xff]  ;;  %s533_s12 = ssub.s32 (%p1100_p3), 3, %s1112_s23  ;;  %s813_s17 = sshll.u32 (%p1100_p3), %s1003_s14, 4 }
  0x15   : > { %s812_s25 = sshll.u32 %s1120_s24, 4  ;;  %s792_s29 = sshll.u32 %s1120_s24, 3  ;;  %v478_v54 = vld [vmem:[#allocation3] sm:$0xff]  ;;  %v479_v58 = vld [vmem:[#allocation3 + $0x8] sm:$0xff] }
  0x16   : > { %s271_s28 = scalar_lea.vmem %s1213_s0, %s812_s25  ;;  %s287_s5 = scalar_lea.vmem %s1214_s1, %s792_s29  ;;  %v487_v48 = vld [vmem:[#allocation4] sm:$0xff]  ;;  %v488_v63 = vld [vmem:[#allocation4 + $0x8] sm:$0xff] }
  0x17   : > { %v325_v4 = vld [vmem:[%s271_s28] sm:$0xff]  ;;  %v326_v5 = vld [vmem:[%s271_s28 + $0x8] sm:$0xff]  ;;  %v1130_v7 = vld [vmem:[%s271_s28 + $0x10] sm:$0xff]  ;;  %s301_s9 = scalar_lea.vmem %s1215_s2, %s792_s29  ;;  %p534_p9 = scmp.lt.s32.totalorder (%p1100_p3), %s533_s12, 2 }
  0x18   : > { %v431_v6 = vsel %vm429_vm1, %v326_v5, -inf  ;;  %v328_v8 = vld [vmem:[%s271_s28 + $0x18] sm:$0xff]  ;;  %v332_v14 = vld [vmem:[%s287_s5] sm:$0xff]  ;;  %v333_v23 = vld [vmem:[%s287_s5 + $0x8] sm:$0xff]  ;;  %s1174_s24 = scalar_lea.vmem (%p1100_p3), %s1216_s3, %s813_s17  }
  0x19   : > { %v436_v9 = vmax.f32 %v325_v4, %v431_v6  ;;  %v433_v10 = vsel %vm429_vm1, %v328_v8, -inf }
  0x1a   : > { %v439_v11 = vmax.f32 %v1130_v7, %v433_v10 }
  0x1b   : > { %437 = vmax.xlane.f32.xlu0 %v436_v9 }
  0x1f   : > { %440 = vmax.xlane.f32.xlu0 %v439_v11 }
  0x35   : > { %339 = vperm.xlu0 %924, %v332_v14  }
  0xa8   : > { %v438_v16 = vpop.xlane.xlu0 %437 }
  0xa9   : > { %v442_v17 = vmax.f32 %v434_v15, %v438_v16  ;;  %v520_v16 = vld [vmem:[%s301_s9 + $0x8] sm:$0xff] }
  0xab   : > { %v444_v19 = vsub.f32 %v434_v15, %v442_v17  ;;  %503 = vst.msk [vmem:[#allocation2] sm:$0xff] %vm316_vm0, %v442_v17  ;;  %452 = vperm.xlu1 %923, %v442_v17  }
  0xac   : > { %v441_v20 = vpop.xlane.xlu0 %440 }
  0xad   : > { %v443_v21 = vmax.f32 %v435_v18, %v441_v20  ;;  %v446_v51 = vmul.f32 1.442695, %v444_v19 }
  0xaf   : > { %v445_v22 = vsub.f32 %v435_v18, %v443_v21  ;;  %504 = vst.msk [vmem:[#allocation2 + $0x8] sm:$0xff] %vm316_vm0, %v443_v21  ;;  %457 = vperm.xlu1 %923, %v443_v21  }
  0xb1   : > { %v448_v52 = vmul.f32 1.442695, %v445_v22 }
  0xb3   : > { %342 = vperm.xlu1 %923, %v333_v23  }
  0xb4   : > { %v340_v24 = vpop.permute.xlu0 %339 }
  0xb5   : > { %vm344_vm2 = vcmp.eq.s32.totalorder %v1117_v2, %v340_v24  ;;  %vm345_vm3 = vcmp.eq.s32.totalorder %v1123_v3, %v340_v24 }
  0xb6   : > { %v489_v25 = vsel %vm344_vm2, %v325_v4, 0.0  ;;  %v490_v26 = vsel %vm345_vm3, %v431_v6, 0.0  ;;  %v506_v13 = vld [vmem:[#allocation2 + $0x8] sm:$0xff] }
  0xb7   : > { %v493_v27 = vadd.f32 %v490_v26, %v489_v25 }
  0xb9   : > { %494 = vadd.xlane.f32.xlu0 %v493_v27 }
 0x12a   : > { %v453_v28 = vpop.permute.xlu1 %452 }
 0x12b   : > { %v460_v29 = vsub.f32 %v325_v4, %v453_v28  ;;  %v461_v30 = vsub.f32 %v431_v6, %v453_v28  ;;  %v505_v6 = vld [vmem:[#allocation2] sm:$0xff] }
 0x12d   : > { %v464_v31 = vmul.f32 1.442695, %v460_v29  ;;  %v466_v32 = vmul.f32 1.442695, %v461_v30 }
 0x12e   : > { %v458_v33 = vpop.permute.xlu1 %457 }
 0x12f   : > { %925 = vpow2.f32 %v464_v31  ;;  %v462_v34 = vsub.f32 %v1130_v7, %v458_v33  ;;  %v463_v35 = vsub.f32 %v433_v10, %v458_v33 }
 0x130   : > { %927 = vpow2.f32 %v466_v32 }
 0x131   : > { %v468_v36 = vmul.f32 1.442695, %v462_v34  ;;  %v470_v37 = vmul.f32 1.442695, %v463_v35 }
 0x132   : > { %v343_v40 = vpop.permute.xlu1 %342 }
 0x133   : > { %929 = vpow2.f32 %v468_v36  ;;  %vm346_vm4 = vcmp.eq.s32.totalorder %v1117_v2, %v343_v40  ;;  %vm347_vm5 = vcmp.eq.s32.totalorder %v1123_v3, %v343_v40 }
 0x134   : > { %931 = vpow2.f32 %v470_v37  ;;  %v491_v45 = vsel %vm346_vm4, %v1130_v7, 0.0  ;;  %v492_v46 = vsel %vm347_vm5, %v433_v10, 0.0  ;;  %v519_v10 = vld [vmem:[%s301_s9] sm:$0xff] }
 0x135   : > { %v496_v47 = vadd.f32 %v492_v46, %v491_v45  ;;  %933 = vpow2.f32 %v446_v51 }
 0x136   : > { %935 = vpow2.f32 %v448_v52 }
 0x139   : > { %v926_v38 = vpop.eup %925 }
 0x13a   : > { %v928_v39 = vpop.eup %927 }
 0x13b   : > { %v472_v41 = vadd.f32 %v928_v39, %v926_v38 }
 0x13d   : > { %v930_v42 = vpop.eup %929  ;;  %473 = vadd.xlane.f32.xlu1 %v472_v41 }
 0x13e   : > { %v932_v43 = vpop.eup %931 }
 0x13f   : > { %v475_v44 = vadd.f32 %v932_v43, %v930_v42  ;;  %v934_v53 = vpop.eup %933 }
 0x140   : > { %v480_v55 = vmul.f32 %v934_v53, %v478_v54  ;;  %v936_v56 = vpop.eup %935 }
 0x141   : > { %476 = vadd.xlane.f32.xlu1 %v475_v44  ;;  %v481_v60 = vmul.f32 %v936_v56, %v479_v58 }
 0x145   : > { %497 = vadd.xlane.f32.xlu1 %v496_v47 }
 0x146   : > { %v495_v49 = vpop.xlane.xlu0 %494 }
 0x147   : > { %v499_v50 = vadd.f32 %v495_v49, %v487_v48 }
 0x149   : > { %501 = vst.msk [vmem:[#allocation4] sm:$0xff] %vm316_vm0, %v499_v50 }
 0x150   : > { %v515_v7 = vld [vmem:[#allocation4] sm:$0xff] }
 0x1ca   : > { %v474_v57 = vpop.xlane.xlu1 %473 }
 0x1cb   : > { %v482_v59 = vadd.f32 %v480_v55, %v474_v57 }
 0x1cd   : > { %485 = vst.msk [vmem:[#allocation3] sm:$0xff] %vm316_vm0, %v482_v59 }
 0x1ce   : > { %v477_v61 = vpop.xlane.xlu1 %476 }
 0x1cf   : > { %v483_v62 = vadd.f32 %v481_v60, %v477_v61 }
 0x1d1   : > { %486 = vst.msk [vmem:[#allocation3 + $0x8] sm:$0xff] %vm316_vm0, %v483_v62 }
 0x1d2   : > { %v498_v0 = vpop.xlane.xlu1 %497 }
 0x1d3   : > { %v500_v1 = vadd.f32 %v498_v0, %v488_v63 }
 0x1d4   : > { %v507_v2 = vld [vmem:[#allocation3] sm:$0xff] }
 0x1d5   : > { %937 = vlog2.f32 %v507_v2  ;;  %502 = vst.msk [vmem:[#allocation4 + $0x8] sm:$0xff] %vm316_vm0, %v500_v1 }
 0x1d8   : > { %v508_v3 = vld [vmem:[#allocation3 + $0x8] sm:$0xff] }
 0x1d9   : > { %939 = vlog2.f32 %v508_v3 }
 0x1dc   : > { %v516_v17 = vld [vmem:[#allocation4 + $0x8] sm:$0xff] }
 0x1df   : > { %v938_v4 = vpop.eup %937 }
 0x1e0   : > { %v510_v5 = vmul.f32 0.6931472, %v938_v4 }
 0x1e2   : > { %v513_v8 = vadd.f32 %v510_v5, %v505_v6 }
 0x1e3   : > { %v940_v9 = vpop.eup %939 }
 0x1e4   : > { %v512_v11 = vmul.f32 0.6931472, %v940_v9  ;;  %v517_v12 = vsub.f32 %v513_v8, %v515_v7 }
 0x1e6   : > { %v514_v14 = vadd.f32 %v512_v11, %v506_v13  ;;  %v521_v15 = vmul.f32 %v519_v10, %v517_v12  ;;  %531 = sbr.rel (!%p1100_p3) target bundleno = 542 (0x21e), region = 48 }
 0x1e8   : > { %v518_v18 = vsub.f32 %v514_v14, %v516_v17  ;;  %523 = vst.msk [vmem:[%s1161_s11] sm:$0xff] %vm316_vm0, %v521_v15 }
 0x1ea   : > { %v522_v19 = vmul.f32 %v520_v16, %v518_v18 }
 0x1ec   : > { %524 = vst.msk [vmem:[%s1161_s11 + $0x8] sm:$0xff] %vm316_vm0, %v522_v19 }
 0x1ed   : > { %s1225_s12 = smov (!%p534_p9, %s533_s12), 2 }
 0x1ee   : > { %s797_s25 = sshll.u32 %s1225_s12, 7 }
 0x1ef   : > { %p800_p10 = scmp.eq.s32.totalorder %s797_s25, 0 }
 0x1f0   : > { %s1180_s26 = sshrl.u32 (!%p800_p10), %s1225_s12, 1 }
 0x1f1   : > { %542 = sbr.rel (%p800_p10) target bundleno = 542 (0x21e), region = 52  ;;  %p801_p11 = scmp.le.s32.totalorder (!%p800_p10), %s1180_s26, 0 }
 0x1f8   : > { %718 = sbr.rel (%p801_p11) target bundleno = 521 (0x209), region = 134  ;;  %s1013_s14 = smov (!%p801_p11), %s1174_s24  }
 0x1f9   : > { %s1017_s20 = smov (!%p801_p11), %s1161_s11   ;;  %s1021_s23 = smov (!%p801_p11), 0  }
 0x1fa   : > { %s1025_s27 = smov (!%p801_p11), 0  }
 0x1ff LB: >> { %v606_v20 = vld [vmem:[%s1019_s20] sm:$0xff]  ;;  %v608_v21 = vld [vmem:[%s1019_s20 + $0x8] sm:$0xff]  ;;  %s610_s28 = sadd.s32 1, %s1023_s23  ;;  %s600_s27 = sadd.s32 1, %s1027_s27   ;;  %s1027_s27 = sphi %s1025_s27, %s600_s27   ;;  %s1023_s23 = sphi %s1021_s23, %s1022_s23   ;;  %s1019_s20 = sphi %s1017_s20, %s615_s20   ;;  %s1015_s14 = sphi %s1013_s14, %s616_s14  }
 0x200   : >> { %607 = vst [vmem:[%s1015_s14] sm:$0xff] %v606_v20  ;;  %609 = vst [vmem:[%s1015_s14 + $0x8] sm:$0xff] %v608_v21  ;;  %p611_p12 = scmp.ge.s32.totalorder %s610_s28, %s1180_s26  ;;  %p599_p13 = scmp.ge.s32.totalorder %s600_s27, %s1180_s26 }
 0x202   : >> { %s1227_s28 = smov (%p611_p12, %s610_s28), 0  ;;  %602 = sbr.rel (!%p599_p13) target bundleno = 511 (0x1ff), region = 140 }
 0x203   : >> { %s802_s29 = sshll.u32 %s1227_s28, 4  ;;  %s1022_s23 = smov %s1227_s28  }
 0x204   : >> { %s615_s20 = scalar_lea.vmem %s1161_s11, %s802_s29 [#allocation6]   ;;  %s616_s14 = scalar_lea.vmem %s1174_s24, %s802_s29  }
 0x209 PF: > { %s1190_s30 = sand.u32 1, %s1225_s12   ;;  %s814_s4 = sshll.u32 %s1180_s26, 4 }
 0x20a   : > { %s621_s5 = scalar_lea.vmem %s1161_s11, %s814_s4 [#allocation6]   ;;  %s623_s6 = scalar_lea.vmem %s1174_s24, %s814_s4  }
 0x20b   : > { %p807_p0 = scmp.le.s32.totalorder %s1190_s30, 0 }
 0x20c   : > { %s1029_s7 = smov (!%p807_p0), %s623_s6   ;;  %s1033_s8 = smov (!%p807_p0), %s621_s5  }
 0x20d   : > { %732 = sbr.rel (%p807_p0) target bundleno = 542 (0x21e), region = 145  ;;  %s1037_s9 = smov (!%p807_p0), 0  }
 0x20e   : > { %s1041_s10 = smov (!%p807_p0), 0  }
 0x214 LB: >> { %v633_v22 = vld [vmem:[%s1035_s8] sm:$0xff]  ;;  %s635_s12 = sadd.s32 1, %s1039_s9  ;;  %s627_s10 = sadd.s32 1, %s1043_s10   ;;  %s1043_s10 = sphi %s1041_s10, %s627_s10   ;;  %s1039_s9 = sphi %s1037_s9, %s1038_s9   ;;  %s1035_s8 = sphi %s1033_s8, %s640_s8   ;;  %s1031_s7 = sphi %s1029_s7, %s641_s7  }
 0x215   : >> { %634 = vst [vmem:[%s1031_s7] sm:$0xff] %v633_v22  ;;  %p636_p1 = scmp.ge.s32.totalorder %s635_s12, %s1190_s30  ;;  %p626_p2 = scmp.ge.s32.totalorder %s627_s10, %s1190_s30 }
 0x217   : >> { %s1229_s12 = smov (%p636_p1, %s635_s12), 0  ;;  %629 = sbr.rel (!%p626_p2) target bundleno = 532 (0x214), region = 151 }
 0x218   : >> { %s808_s11 = sshll.u32 %s1229_s12, 3  ;;  %s1038_s9 = smov %s1229_s12  }
 0x219   : >> { %s640_s8 = scalar_lea.vmem %s621_s5, %s808_s11 [#allocation6]   ;;  %s641_s7 = scalar_lea.vmem %s623_s6, %s808_s11  }
 0x21e PF: > { %s13_s16 = sadd.s32 1, %s1011_s16   ;;  %s1218_s12 = smov %s999_s13 }
 0x21f   : > { %p10_p3 = scmp.ge.s32.totalorder %s13_s16, 4   ;;  %s1219_s13 = smov %s1109_s22 }
 0x220   : > { %s1220_s14 = smov %s1007_s15  ;;  %s1221_s15 = smov %s1223_s18 }
 0x221   :  { %12 = sbr.rel (!%p10_p3) target bundleno = 3 (0x3), region = 162 }

</bundles_post_ra>
